<compile_context>
chip_gen: v5e
topology: v5e:2x2
jax: 0.10.0
libtpu: 0.0.40
codegen_flags: <defaults>
</compile_context>

<pallas_src>
import jax
import jax.numpy as jnp
from jax.experimental import pallas as pl
from jax.experimental.pallas import tpu as pltpu


def _round_up(n, m):
    return ((n + m - 1) // m) * m


# ---------------------------------------------------------------------------
# Kernel 1: GRU recurrence + 2-slot attention (tiny, gridless pre-pass).
# ---------------------------------------------------------------------------
def gru_attn_kernel(
    x2d_ref, h0_ref, uie_ref,
    wih_ref, bih_ref, whh_ref, bhn_ref,
    w10v_ref, w10q_ref, b10_ref,
    ha_ref, hout_ref,
    xproj_ref,
):
    Bp, HP = h0_ref.shape
    S = x2d_ref.shape[0] // Bp
    M = uie_ref.shape[1]
    H = ha_ref.shape[1] - M
    f32 = jnp.float32

    # Hoisted input-side GRU projection (one batched matmul), kept in VMEM
    # scratch so the unrolled recurrence reads a fresh (Bp, 3HP) slice per
    # step instead of holding the whole value in vregs.
    # bias already contains [bir+bhr | biz+bhz | bin] (folded host-side).
    xproj_ref[...] = (
        jnp.dot(x2d_ref[...], wih_ref[...], preferred_element_type=f32)
        + bih_ref[...])

    whh = whh_ref[...]            # (HP, 3HP), gate blocks lane-padded to 128
    bhn = bhn_ref[...]            # (1, HP)
    h = h0_ref[...]               # (Bp, HP), padding lanes are zero

    # GRU recurrence (PyTorch gate semantics), fully unrolled (S is static).
    for t in range(S):
        xp = xproj_ref[t * Bp:(t + 1) * Bp]                       # (Bp, 3HP)
        hp = jnp.dot(h, whh, preferred_element_type=f32)          # (Bp, 3HP)
        r = jax.nn.sigmoid(xp[:, 0:HP] + hp[:, 0:HP])
        z = jax.nn.sigmoid(xp[:, HP:2 * HP] + hp[:, HP:2 * HP])
        n = jnp.tanh(xp[:, 2 * HP:3 * HP] + r * (hp[:, 2 * HP:3 * HP] + bhn))
        h = (1.0 - z) * n + z * h

    hout_ref[...] = h             # padded (Bp, HP); wrapper slices back
    h_t = h[:, :H]                # one-time slice to true hidden width

    # Attention over the two value slots [user_embed; item_embed].
    uie = uie_ref[...]            # (2Bp, M) stacked
    ue = uie[0:Bp]
    ie = uie[Bp:2 * Bp]

    # Width-1 projections via VPU multiply + XLU lane reduction (no MXU).
    hq = jnp.sum(h_t * w10q_ref[...], axis=-1, keepdims=True) + b10_ref[...]
    s_u = jnp.sum(ue * w10v_ref[...], axis=-1, keepdims=True)
    s_i = jnp.sum(ie * w10v_ref[...], axis=-1, keepdims=True)
    a2_u = jnp.exp(jnp.tanh(s_u + hq))
    a2_i = jnp.exp(jnp.tanh(s_i + hq))
    a4 = a2_u + a2_i + 1e-6       # mask == ones(2, B)  =>  a3 == a2
    a_t = (a2_u / a4) * ue + (a2_i / a4) * ie                     # (Bp, M)

    ha_ref[...] = jnp.concatenate([h_t, a_t], axis=1)             # (Bp, H+M)


# ---------------------------------------------------------------------------
# Kernel 2: vocab projection, tiled over lane-dense V blocks.
# ---------------------------------------------------------------------------
def vocab_proj_kernel(ha_ref, w13_ref, b13_ref, probit_ref):
    w = w13_ref[...]                                              # (H+M, TV)
    acc = jnp.dot(ha_ref[...].astype(w.dtype), w,
                  preferred_element_type=jnp.float32)
    probit_ref[...] = (acc + b13_ref[...]).astype(probit_ref.dtype)


# ---------------------------------------------------------------------------
# Wrapper
# ---------------------------------------------------------------------------
def decoder_forward(x, hidden_state, user_embed, item_embed, params,
                    *, w13_dtype=jnp.float32, tile_v=512):
    """x: (S, B, Din); hidden_state: (1, B, H); user/item_embed: (B, M).

    w13_dtype=jnp.bfloat16 streams the vocab weights as bf16 (f32 accumulate)
    — recommended at realistic vocab sizes where the projection is HBM-bound.
    """
    S, B, Din = x.shape
    H = hidden_state.shape[-1]
    M = user_embed.shape[-1]
    V = params["b13"].shape[-1]
    f32 = jnp.float32

    Bp = _round_up(max(B, 8), 8)         # sublane-dense batch rows
    HP = _round_up(H, 128)               # lane-dense gate blocks (full vreg)
    TV = max(128, (min(tile_v, _round_up(V, 128)) // 128) * 128)  # V tile
    Vp = _round_up(V, TV)                # lane-dense, tile-divisible vocab

    def pad_lanes(a, width):
        return jnp.pad(a, ((0, 0), (0, width - a.shape[-1])))

    # ---- host-side weight fusion / bias folding / padding (layout only) ----
    wih = jnp.concatenate([pad_lanes(params["wir"], HP),
                           pad_lanes(params["wiz"], HP),
                           pad_lanes(params["win"], HP)], axis=1)   # (Din, 3HP)
    bih = jnp.concatenate([pad_lanes(params["bir"] + params["bhr"], HP),
                           pad_lanes(params["biz"] + params["bhz"], HP),
                           pad_lanes(params["bin"], HP)], axis=1)   # (1, 3HP)
    whh = jnp.concatenate([pad_lanes(params["whr"], HP),
                           pad_lanes(params["whz"], HP),
                           pad_lanes(params["whn"], HP)], axis=1)
    whh = jnp.pad(whh, ((0, HP - H), (0, 0)))                       # (HP, 3HP)
    bhn = pad_lanes(params["bhn"], HP)                              # (1, HP)

    w10v = params["w10v"].reshape(M, 1).T                           # (1, M)
    w10q = params["w10q"].reshape(H, 1).T                           # (1, H)
    b10 = params["b10"]                                             # (1, 1)

    w13 = jnp.concatenate([params["w13h"], params["w13a"]], axis=0)  # (H+M, V)
    w13 = jnp.pad(w13, ((0, 0), (0, Vp - V))).astype(w13_dtype)
    b13 = jnp.pad(params["b13"], ((0, 0), (0, Vp - V))).astype(f32)

    # ---- pad activations; x pre-reshaped to 2-D time-major ----
    x2d = jnp.pad(x, ((0, 0), (0, Bp - B), (0, 0))).reshape(S * Bp, Din).astype(f32)
    h0p = jnp.pad(hidden_state.reshape(B, H),
                  ((0, Bp - B), (0, HP - H))).astype(f32)            # (Bp, HP)
    uie = jnp.concatenate(
        [jnp.pad(user_embed, ((0, Bp - B), (0, 0))),
         jnp.pad(item_embed, ((0, Bp - B), (0, 0)))], axis=0).astype(f32)

    # ---- pass 1: GRU + attention (gridless, tiny) ----
    vmem = pl.BlockSpec(memory_space=pltpu.MemorySpace.VMEM)
    ha, hout_p = pl.pallas_call(
        gru_attn_kernel,
        out_shape=(jax.ShapeDtypeStruct((Bp, H + M), f32),
                   jax.ShapeDtypeStruct((Bp, HP), f32)),
        in_specs=[vmem] * 10,
        out_specs=(vmem, vmem),
        scratch_shapes=[pltpu.VMEM((S * Bp, 3 * HP), f32)],
        input_output_aliases={1: 1},   # h0 buffer reused for hout
    )(x2d, h0p, uie, wih, bih, whh, bhn, w10v, w10q, b10)

    # ---- pass 2: vocab projection, grid over V tiles (double-buffered DMA,
    #      parallel across TensorCores on v7x) ----
    w13_itemsize = jnp.dtype(w13_dtype).itemsize
    vmem_bytes = (2 * (H + M) * TV * w13_itemsize    # double-buffered w13 tile
                  + 2 * Bp * TV * 4                  # double-buffered probit tile
                  + 2 * 8 * TV * 4                   # b13 tiles (sublane-padded)
                  + 2 * Bp * (H + M) * 4)            # ha
    vmem_limit = int(min(max(2 * vmem_bytes, 16 * 1024 * 1024),
                         64 * 1024 * 1024))

    grid = (Vp // TV,)
    probit_p = pl.pallas_call(
        vocab_proj_kernel,
        out_shape=jax.ShapeDtypeStruct((Bp, Vp), f32),
        grid_spec=pltpu.PrefetchScalarGridSpec(
            num_scalar_prefetch=0,
            grid=grid,
            in_specs=[pl.BlockSpec((Bp, H + M), lambda j: (0, 0)),
                      pl.BlockSpec((H + M, TV), lambda j: (0, j)),
                      pl.BlockSpec((1, TV), lambda j: (0, j))],
            out_specs=pl.BlockSpec((Bp, TV), lambda j: (0, j)),
        ),
        compiler_params=pltpu.CompilerParams(
            dimension_semantics=("parallel",),
            vmem_limit_bytes=vmem_limit),
    )(ha, w13, b13)

    return probit_p[:B, :V], hout_p[:B, :H].reshape(1, B, H)


# ---------------------------------------------------------------------------
# Deterministic parameter construction (xavier-uniform weights, zero biases,
# mirroring decoder.reinit() semantics; not a bit-exact torch reproduction).
# ---------------------------------------------------------------------------
def xavier_uniform(key, shape, fan_in, fan_out):
    bound = (6.0 / (fan_in + fan_out)) ** 0.5
    return jax.random.uniform(key, shape, jnp.float32, -bound, bound)


def make_params(key, word_dim, hidden_dim, mf_dim, vocab_sz):
    k = jax.random.split(key, 5)
    H, Din, M, V = hidden_dim, word_dim, mf_dim, vocab_sz

    # GRU weights, PyTorch layout (3H, in), gate order r, z, n.
    w_ih = xavier_uniform(k[0], (3 * H, Din), Din, 3 * H)
    w_hh = xavier_uniform(k[1], (3 * H, H), H, 3 * H)
    # linear_eq_10: (1, M+H); linear_eq_13: (V, H+M)
    w10 = xavier_uniform(k[2], (1, M + H), M + H, 1)
    w13 = xavier_uniform(k[3], (V, H + M), H + M, V)

    zeros_h = jnp.zeros((1, H), jnp.float32)
    return dict(
        wir=w_ih[0:H].T, wiz=w_ih[H:2 * H].T, win=w_ih[2 * H:3 * H].T,
        whr=w_hh[0:H].T, whz=w_hh[H:2 * H].T, whn=w_hh[2 * H:3 * H].T,
        bir=zeros_h, biz=zeros_h, bin=zeros_h,
        bhr=zeros_h, bhz=zeros_h, bhn=zeros_h,
        w10v=w10[:, :M].T, w10q=w10[:, M:].T, b10=jnp.zeros((1, 1), jnp.float32),
        w13h=w13[:, :H].T, w13a=w13[:, H:].T, b13=jnp.zeros((1, V), jnp.float32),
    )


# ---------------------------------------------------------------------------
# Pure-JAX reference (correctness check of the kernels).
# ---------------------------------------------------------------------------
def decoder_reference(x, hidden_state, user_embed, item_embed, p):
    S, B, Din = x.shape
    H = hidden_state.shape[-1]
    h = hidden_state.reshape(B, H)
    for t in range(S):
        xt = x[t]
        r = jax.nn.sigmoid(xt @ p["wir"] + p["bir"] + h @ p["whr"] + p["bhr"])
        z = jax.nn.sigmoid(xt @ p["wiz"] + p["biz"] + h @ p["whz"] + p["bhz"])
        n = jnp.tanh(xt @ p["win"] + p["bin"] + r * (h @ p["whn"] + p["bhn"]))
        h = (1.0 - z) * n + z * h
    hq = h @ p["w10q"] + p["b10"]
    a1_u = jnp.tanh(user_embed @ p["w10v"] + hq)
    a1_i = jnp.tanh(item_embed @ p["w10v"] + hq)
    a2_u, a2_i = jnp.exp(a1_u), jnp.exp(a1_i)
    a4 = a2_u + a2_i + 1e-6
    a_t = (a2_u / a4) * user_embed + (a2_i / a4) * item_embed
    probit = h @ p["w13h"] + a_t @ p["w13a"] + p["b13"]
    return probit, h.reshape(1, B, H)


if __name__ == "__main__":
    # conf: word_dim=32, hidden_dim=32, mf_dim=16
    S, B = 3, 4
    WORD_DIM, HIDDEN_DIM, MF_DIM = 32, 32, 16

    key = jax.random.PRNGKey(0)
    kx, kh, ku, ki, kp = jax.random.split(key, 5)

    x = jax.random.normal(kx, (S, B, WORD_DIM), jnp.float32)
    hidden_state = jax.random.normal(kh, (1, B, HIDDEN_DIM), jnp.float32)
    user_embed = jax.random.normal(ku, (B, MF_DIM), jnp.float32)
    item_embed = jax.random.normal(ki, (B, MF_DIM), jnp.float32)

    # Two configs: single V tile, and a multi-tile grid (V=300 -> 3 tiles).
    for vocab_sz, tile_v in ((64, 512), (300, 128)):
        params = make_params(kp, WORD_DIM, HIDDEN_DIM, MF_DIM, vocab_sz)
        probit_ref, hout_ref = decoder_reference(
            x, hidden_state, user_embed, item_embed, params)

        # f32-streamed w13 (strict check).
        probit, hout = decoder_forward(
            x, hidden_state, user_embed, item_embed, params, tile_v=tile_v)
        probit = jax.block_until_ready(probit)
        hout = jax.block_until_ready(hout)
        assert probit.shape == (B, vocab_sz) and hout.shape == (1, B, HIDDEN_DIM)
        assert jnp.allclose(probit, probit_ref, atol=1e-4, rtol=1e-4)
        assert jnp.allclose(hout, hout_ref, atol=1e-4, rtol=1e-4)

        # bf16-streamed w13 (production memory-bound path, loose check).
        probit_bf, hout_bf = decoder_forward(
            x, hidden_state, user_embed, item_embed, params,
            w13_dtype=jnp.bfloat16, tile_v=tile_v)
        probit_bf = jax.block_until_ready(probit_bf)
        hout_bf = jax.block_until_ready(hout_bf)
        assert jnp.allclose(probit_bf, probit_ref, atol=5e-2, rtol=5e-2)
        assert jnp.allclose(hout_bf, hout_ref, atol=1e-4, rtol=1e-4)

    print("KERNEL_OK")
</pallas_src>

<mosaic_0001>
module attributes {stable_mosaic.version = 11 : i64} {
  func.func @gru_attn_kernel(%arg0: memref<24x32xf32, #tpu.memory_space<vmem>>, %arg1: memref<8x128xf32, #tpu.memory_space<vmem>>, %arg2: memref<16x16xf32, #tpu.memory_space<vmem>>, %arg3: memref<32x384xf32, #tpu.memory_space<vmem>>, %arg4: memref<1x384xf32, #tpu.memory_space<vmem>>, %arg5: memref<128x384xf32, #tpu.memory_space<vmem>>, %arg6: memref<1x128xf32, #tpu.memory_space<vmem>>, %arg7: memref<1x16xf32, #tpu.memory_space<vmem>>, %arg8: memref<1x32xf32, #tpu.memory_space<vmem>>, %arg9: memref<1x1xf32, #tpu.memory_space<vmem>>, %arg10: memref<8x48xf32, #tpu.memory_space<vmem>>, %arg11: memref<8x128xf32, #tpu.memory_space<vmem>>, %arg12: memref<24x384xf32, #tpu.memory_space<vmem>>) attributes {dimension_semantics = [], scalar_prefetch = 0 : i64, scratch_operands = 1 : i64, tpu.core_type = #tpu.core_type<tc>} {
    %c0 = arith.constant 0 : index
    %c0_0 = arith.constant 0 : index
    %0 = vector.load %arg0[%c0, %c0_0] : memref<24x32xf32, #tpu.memory_space<vmem>>, vector<24x32xf32>
    %c0_1 = arith.constant 0 : index
    %c0_2 = arith.constant 0 : index
    %1 = vector.load %arg3[%c0_1, %c0_2] : memref<32x384xf32, #tpu.memory_space<vmem>>, vector<32x384xf32>
    %cst = arith.constant dense<0.000000e+00> : vector<24x384xf32>
    %2 = tpu.matmul %0, %1, %cst {dimension_numbers = #tpu.dot_dimension_numbers<[1], [0], [0], [1], [0, 0, 1, 1], [], []>} : vector<24x32xf32>, vector<32x384xf32>, vector<24x384xf32> -> vector<24x384xf32>
    %c0_3 = arith.constant 0 : index
    %c0_4 = arith.constant 0 : index
    %3 = vector.load %arg4[%c0_3, %c0_4] : memref<1x384xf32, #tpu.memory_space<vmem>>, vector<1x384xf32>
    %4 = vector.broadcast %3 : vector<1x384xf32> to vector<24x384xf32>
    %5 = arith.addf %2, %4 : vector<24x384xf32>
    %c0_5 = arith.constant 0 : index
    %c0_6 = arith.constant 0 : index
    %6 = vector.load %arg12[%c0_5, %c0_6] : memref<24x384xf32, #tpu.memory_space<vmem>>, vector<24x384xf32>
    tpu.vector_store %arg12[%c0_5, %c0_6], %5 {strides = array<i32>} : memref<24x384xf32, #tpu.memory_space<vmem>>, vector<24x384xf32>,
    %c0_7 = arith.constant 0 : index
    %c0_8 = arith.constant 0 : index
    %7 = vector.load %arg5[%c0_7, %c0_8] : memref<128x384xf32, #tpu.memory_space<vmem>>, vector<128x384xf32>
    %c0_9 = arith.constant 0 : index
    %c0_10 = arith.constant 0 : index
    %8 = vector.load %arg6[%c0_9, %c0_10] : memref<1x128xf32, #tpu.memory_space<vmem>>, vector<1x128xf32>
    %c0_11 = arith.constant 0 : index
    %c0_12 = arith.constant 0 : index
    %9 = vector.load %arg1[%c0_11, %c0_12] : memref<8x128xf32, #tpu.memory_space<vmem>>, vector<8x128xf32>
    %c0_13 = arith.constant 0 : index
    %c0_14 = arith.constant 0 : index
    %10 = vector.load %arg12[%c0_13, %c0_14] : memref<24x384xf32, #tpu.memory_space<vmem>>, vector<8x384xf32>
    %cst_15 = arith.constant dense<0.000000e+00> : vector<8x384xf32>
    %11 = tpu.matmul %9, %7, %cst_15 {dimension_numbers = #tpu.dot_dimension_numbers<[1], [0], [0], [1], [0, 0, 1, 1], [], []>} : vector<8x128xf32>, vector<128x384xf32>, vector<8x384xf32> -> vector<8x384xf32>
    %12 = vector.extract_strided_slice %10 {offsets = [0, 0], sizes = [8, 128], strides = [1, 1]} : vector<8x384xf32> to vector<8x128xf32>
    %13 = vector.extract_strided_slice %11 {offsets = [0, 0], sizes = [8, 128], strides = [1, 1]} : vector<8x384xf32> to vector<8x128xf32>
    %14 = arith.addf %12, %13 : vector<8x128xf32>
    %15 = arith.negf %14 : vector<8x128xf32>
    %16 = math.exp %15 : vector<8x128xf32>
    %cst_16 = arith.constant 1.000000e+00 : f32
    %17 = vector.broadcast %cst_16 : f32 to vector<8x128xf32>
    %18 = arith.addf %17, %16 : vector<8x128xf32>
    %19 = arith.divf %17, %18 : vector<8x128xf32>
    %20 = vector.extract_strided_slice %10 {offsets = [0, 128], sizes = [8, 128], strides = [1, 1]} : vector<8x384xf32> to vector<8x128xf32>
    %21 = vector.extract_strided_slice %11 {offsets = [0, 128], sizes = [8, 128], strides = [1, 1]} : vector<8x384xf32> to vector<8x128xf32>
    %22 = arith.addf %20, %21 : vector<8x128xf32>
    %23 = arith.negf %22 : vector<8x128xf32>
    %24 = math.exp %23 : vector<8x128xf32>
    %cst_17 = arith.constant 1.000000e+00 : f32
    %25 = vector.broadcast %cst_17 : f32 to vector<8x128xf32>
    %26 = arith.addf %25, %24 : vector<8x128xf32>
    %27 = arith.divf %25, %26 : vector<8x128xf32>
    %28 = vector.extract_strided_slice %10 {offsets = [0, 256], sizes = [8, 128], strides = [1, 1]} : vector<8x384xf32> to vector<8x128xf32>
    %29 = vector.extract_strided_slice %11 {offsets = [0, 256], sizes = [8, 128], strides = [1, 1]} : vector<8x384xf32> to vector<8x128xf32>
    %30 = vector.broadcast %8 : vector<1x128xf32> to vector<8x128xf32>
    %31 = arith.addf %29, %30 : vector<8x128xf32>
    %32 = arith.mulf %19, %31 : vector<8x128xf32>
    %33 = arith.addf %28, %32 : vector<8x128xf32>
    %34 = math.tanh %33 : vector<8x128xf32>
    %cst_18 = arith.constant 1.000000e+00 : f32
    %35 = vector.broadcast %cst_18 : f32 to vector<8x128xf32>
    %36 = arith.subf %35, %27 : vector<8x128xf32>
    %37 = arith.mulf %36, %34 : vector<8x128xf32>
    %38 = arith.mulf %27, %9 : vector<8x128xf32>
    %39 = arith.addf %37, %38 : vector<8x128xf32>
    %c8 = arith.constant 8 : index
    %c0_19 = arith.constant 0 : index
    %40 = vector.load %arg12[%c8, %c0_19] : memref<24x384xf32, #tpu.memory_space<vmem>>, vector<8x384xf32>
    %cst_20 = arith.constant dense<0.000000e+00> : vector<8x384xf32>
    %41 = tpu.matmul %39, %7, %cst_20 {dimension_numbers = #tpu.dot_dimension_numbers<[1], [0], [0], [1], [0, 0, 1, 1], [], []>} : vector<8x128xf32>, vector<128x384xf32>, vector<8x384xf32> -> vector<8x384xf32>
    %42 = vector.extract_strided_slice %40 {offsets = [0, 0], sizes = [8, 128], strides = [1, 1]} : vector<8x384xf32> to vector<8x128xf32>
    %43 = vector.extract_strided_slice %41 {offsets = [0, 0], sizes = [8, 128], strides = [1, 1]} : vector<8x384xf32> to vector<8x128xf32>
    %44 = arith.addf %42, %43 : vector<8x128xf32>
    %45 = arith.negf %44 : vector<8x128xf32>
    %46 = math.exp %45 : vector<8x128xf32>
    %cst_21 = arith.constant 1.000000e+00 : f32
    %47 = vector.broadcast %cst_21 : f32 to vector<8x128xf32>
    %48 = arith.addf %47, %46 : vector<8x128xf32>
    %49 = arith.divf %47, %48 : vector<8x128xf32>
    %50 = vector.extract_strided_slice %40 {offsets = [0, 128], sizes = [8, 128], strides = [1, 1]} : vector<8x384xf32> to vector<8x128xf32>
    %51 = vector.extract_strided_slice %41 {offsets = [0, 128], sizes = [8, 128], strides = [1, 1]} : vector<8x384xf32> to vector<8x128xf32>
    %52 = arith.addf %50, %51 : vector<8x128xf32>
    %53 = arith.negf %52 : vector<8x128xf32>
    %54 = math.exp %53 : vector<8x128xf32>
    %cst_22 = arith.constant 1.000000e+00 : f32
    %55 = vector.broadcast %cst_22 : f32 to vector<8x128xf32>
    %56 = arith.addf %55, %54 : vector<8x128xf32>
    %57 = arith.divf %55, %56 : vector<8x128xf32>
    %58 = vector.extract_strided_slice %40 {offsets = [0, 256], sizes = [8, 128], strides = [1, 1]} : vector<8x384xf32> to vector<8x128xf32>
    %59 = vector.extract_strided_slice %41 {offsets = [0, 256], sizes = [8, 128], strides = [1, 1]} : vector<8x384xf32> to vector<8x128xf32>
    %60 = vector.broadcast %8 : vector<1x128xf32> to vector<8x128xf32>
    %61 = arith.addf %59, %60 : vector<8x128xf32>
    %62 = arith.mulf %49, %61 : vector<8x128xf32>
    %63 = arith.addf %58, %62 : vector<8x128xf32>
    %64 = math.tanh %63 : vector<8x128xf32>
    %cst_23 = arith.constant 1.000000e+00 : f32
    %65 = vector.broadcast %cst_23 : f32 to vector<8x128xf32>
    %66 = arith.subf %65, %57 : vector<8x128xf32>
    %67 = arith.mulf %66, %64 : vector<8x128xf32>
    %68 = arith.mulf %57, %39 : vector<8x128xf32>
    %69 = arith.addf %67, %68 : vector<8x128xf32>
    %c16 = arith.constant 16 : index
    %c0_24 = arith.constant 0 : index
    %70 = vector.load %arg12[%c16, %c0_24] : memref<24x384xf32, #tpu.memory_space<vmem>>, vector<8x384xf32>
    %cst_25 = arith.constant dense<0.000000e+00> : vector<8x384xf32>
    %71 = tpu.matmul %69, %7, %cst_25 {dimension_numbers = #tpu.dot_dimension_numbers<[1], [0], [0], [1], [0, 0, 1, 1], [], []>} : vector<8x128xf32>, vector<128x384xf32>, vector<8x384xf32> -> vector<8x384xf32>
    %72 = vector.extract_strided_slice %70 {offsets = [0, 0], sizes = [8, 128], strides = [1, 1]} : vector<8x384xf32> to vector<8x128xf32>
    %73 = vector.extract_strided_slice %71 {offsets = [0, 0], sizes = [8, 128], strides = [1, 1]} : vector<8x384xf32> to vector<8x128xf32>
    %74 = arith.addf %72, %73 : vector<8x128xf32>
    %75 = arith.negf %74 : vector<8x128xf32>
    %76 = math.exp %75 : vector<8x128xf32>
    %cst_26 = arith.constant 1.000000e+00 : f32
    %77 = vector.broadcast %cst_26 : f32 to vector<8x128xf32>
    %78 = arith.addf %77, %76 : vector<8x128xf32>
    %79 = arith.divf %77, %78 : vector<8x128xf32>
    %80 = vector.extract_strided_slice %70 {offsets = [0, 128], sizes = [8, 128], strides = [1, 1]} : vector<8x384xf32> to vector<8x128xf32>
    %81 = vector.extract_strided_slice %71 {offsets = [0, 128], sizes = [8, 128], strides = [1, 1]} : vector<8x384xf32> to vector<8x128xf32>
    %82 = arith.addf %80, %81 : vector<8x128xf32>
    %83 = arith.negf %82 : vector<8x128xf32>
    %84 = math.exp %83 : vector<8x128xf32>
    %cst_27 = arith.constant 1.000000e+00 : f32
    %85 = vector.broadcast %cst_27 : f32 to vector<8x128xf32>
    %86 = arith.addf %85, %84 : vector<8x128xf32>
    %87 = arith.divf %85, %86 : vector<8x128xf32>
    %88 = vector.extract_strided_slice %70 {offsets = [0, 256], sizes = [8, 128], strides = [1, 1]} : vector<8x384xf32> to vector<8x128xf32>
    %89 = vector.extract_strided_slice %71 {offsets = [0, 256], sizes = [8, 128], strides = [1, 1]} : vector<8x384xf32> to vector<8x128xf32>
    %90 = vector.broadcast %8 : vector<1x128xf32> to vector<8x128xf32>
    %91 = arith.addf %89, %90 : vector<8x128xf32>
    %92 = arith.mulf %79, %91 : vector<8x128xf32>
    %93 = arith.addf %88, %92 : vector<8x128xf32>
    %94 = math.tanh %93 : vector<8x128xf32>
    %cst_28 = arith.constant 1.000000e+00 : f32
    %95 = vector.broadcast %cst_28 : f32 to vector<8x128xf32>
    %96 = arith.subf %95, %87 : vector<8x128xf32>
    %97 = arith.mulf %96, %94 : vector<8x128xf32>
    %98 = arith.mulf %87, %69 : vector<8x128xf32>
    %99 = arith.addf %97, %98 : vector<8x128xf32>
    %c0_29 = arith.constant 0 : index
    %c0_30 = arith.constant 0 : index
    %100 = vector.load %arg11[%c0_29, %c0_30] : memref<8x128xf32, #tpu.memory_space<vmem>>, vector<8x128xf32>
    tpu.vector_store %arg11[%c0_29, %c0_30], %99 {strides = array<i32>} : memref<8x128xf32, #tpu.memory_space<vmem>>, vector<8x128xf32>,
    %101 = vector.extract_strided_slice %99 {offsets = [0, 0], sizes = [8, 32], strides = [1, 1]} : vector<8x128xf32> to vector<8x32xf32>
    %c0_31 = arith.constant 0 : index
    %c0_32 = arith.constant 0 : index
    %102 = vector.load %arg2[%c0_31, %c0_32] : memref<16x16xf32, #tpu.memory_space<vmem>>, vector<16x16xf32>
    %103 = vector.extract_strided_slice %102 {offsets = [0, 0], sizes = [8, 16], strides = [1, 1]} : vector<16x16xf32> to vector<8x16xf32>
    %104 = vector.extract_strided_slice %102 {offsets = [8, 0], sizes = [8, 16], strides = [1, 1]} : vector<16x16xf32> to vector<8x16xf32>
    %c0_33 = arith.constant 0 : index
    %c0_34 = arith.constant 0 : index
    %105 = vector.load %arg8[%c0_33, %c0_34] : memref<1x32xf32, #tpu.memory_space<vmem>>, vector<1x32xf32>
    %106 = vector.broadcast %105 : vector<1x32xf32> to vector<8x32xf32>
    %107 = arith.mulf %101, %106 : vector<8x32xf32>
    %cst_35 = arith.constant dense<0.000000e+00> : vector<8xf32>
    %108 = vector.multi_reduction <add>, %107, %cst_35 [1] : vector<8x32xf32> to vector<8xf32>
    %109 = vector.shape_cast %108 : vector<8xf32> to vector<8x1xf32>
    %c0_36 = arith.constant 0 : index
    %c0_37 = arith.constant 0 : index
    %110 = vector.load %arg9[%c0_36, %c0_37] : memref<1x1xf32, #tpu.memory_space<vmem>>, vector<1x1xf32>
    %111 = vector.broadcast %110 : vector<1x1xf32> to vector<8x1xf32>
    %112 = arith.addf %109, %111 : vector<8x1xf32>
    %c0_38 = arith.constant 0 : index
    %c0_39 = arith.constant 0 : index
    %113 = vector.load %arg7[%c0_38, %c0_39] : memref<1x16xf32, #tpu.memory_space<vmem>>, vector<1x16xf32>
    %114 = vector.broadcast %113 : vector<1x16xf32> to vector<8x16xf32>
    %115 = arith.mulf %103, %114 : vector<8x16xf32>
    %cst_40 = arith.constant dense<0.000000e+00> : vector<8xf32>
    %116 = vector.multi_reduction <add>, %115, %cst_40 [1] : vector<8x16xf32> to vector<8xf32>
    %117 = vector.shape_cast %116 : vector<8xf32> to vector<8x1xf32>
    %c0_41 = arith.constant 0 : index
    %c0_42 = arith.constant 0 : index
    %118 = vector.load %arg7[%c0_41, %c0_42] : memref<1x16xf32, #tpu.memory_space<vmem>>, vector<1x16xf32>
    %119 = vector.broadcast %118 : vector<1x16xf32> to vector<8x16xf32>
    %120 = arith.mulf %104, %119 : vector<8x16xf32>
    %cst_43 = arith.constant dense<0.000000e+00> : vector<8xf32>
    %121 = vector.multi_reduction <add>, %120, %cst_43 [1] : vector<8x16xf32> to vector<8xf32>
    %122 = vector.shape_cast %121 : vector<8xf32> to vector<8x1xf32>
    %123 = arith.addf %117, %112 : vector<8x1xf32>
    %124 = math.tanh %123 : vector<8x1xf32>
    %125 = math.exp %124 : vector<8x1xf32>
    %126 = arith.addf %122, %112 : vector<8x1xf32>
    %127 = math.tanh %126 : vector<8x1xf32>
    %128 = math.exp %127 : vector<8x1xf32>
    %129 = arith.addf %125, %128 : vector<8x1xf32>
    %cst_44 = arith.constant 9.99999997E-7 : f32
    %130 = vector.broadcast %cst_44 : f32 to vector<8x1xf32>
    %131 = arith.addf %129, %130 : vector<8x1xf32>
    %132 = arith.divf %125, %131 : vector<8x1xf32>
    %133 = vector.broadcast %132 : vector<8x1xf32> to vector<8x16xf32>
    %134 = arith.mulf %133, %103 : vector<8x16xf32>
    %135 = arith.divf %128, %131 : vector<8x1xf32>
    %136 = vector.broadcast %135 : vector<8x1xf32> to vector<8x16xf32>
    %137 = arith.mulf %136, %104 : vector<8x16xf32>
    %138 = arith.addf %134, %137 : vector<8x16xf32>
    %139 = tpu.concatenate %101, %138 in 1 : vector<8x32xf32>, vector<8x16xf32> -> vector<8x48xf32>
    %c0_45 = arith.constant 0 : index
    %c0_46 = arith.constant 0 : index
    %140 = vector.load %arg10[%c0_45, %c0_46] : memref<8x48xf32, #tpu.memory_space<vmem>>, vector<8x48xf32>
    tpu.vector_store %arg10[%c0_45, %c0_46], %139 {strides = array<i32>} : memref<8x48xf32, #tpu.memory_space<vmem>>, vector<8x48xf32>,
    return
  }
}

</mosaic_0001>

<bundles_post_ra>
// kernel: tpu_custom_call.1
= control target key start
LH: loop header
LB: loop body
LE: loop exit
PB: predicated region body
PF: predicated region fallthrough
CT: control target
= control target key end

     0   :  { %s1450_s0 = inlined_call_operand.vmem [shape: f32[24,32], index: 0, kind: input, shape index: {}]   ;;  %s1451_s1 = inlined_call_operand.hbm [shape: f32[8,128], index: 1, kind: input, shape index: {}, may-alias: {1,11}]   ;;  %s1452_s2 = inlined_call_operand.hbm [shape: f32[16,16], index: 2, kind: input, shape index: {}]   ;;  %s1453_s3 = inlined_call_operand.hbm [shape: f32[32,384], index: 3, kind: input, shape index: {}]   ;;  %s1454_s4 = inlined_call_operand.hbm [shape: f32[1,384], index: 4, kind: input, shape index: {}]   ;;  %s1455_s5 = inlined_call_operand.hbm [shape: f32[128,384], index: 5, kind: input, shape index: {}]   ;;  %s1456_s6 = inlined_call_operand.vmem [shape: f32[1,128], index: 6, kind: input, shape index: {}]   ;;  %s1457_s7 = inlined_call_operand.vmem [shape: f32[1,16], index: 7, kind: input, shape index: {}]   ;;  %s1458_s8 = inlined_call_operand.hbm [shape: f32[1,32], index: 8, kind: input, shape index: {}]   ;;  %s1459_s9 = inlined_call_operand.<no memory space> [shape: f32[1,1], index: 9, kind: input, shape index: {}]   ;;  %s1460_s10 = inlined_call_operand.hbm [shape: f32[8,48], index: 10, kind: output, shape index: {0}]   ;;  %s1461_s11 = inlined_call_operand.hbm [shape: f32[8,128], index: 11, kind: output, shape index: {1}, may-alias: {1,11}]  }
   0x1   :  { %v17_v0 = vstv %s1459_s9 }
   0x2   :  { %18 = vst [vmem:[#allocation3] sm:$0x1] %v17_v0 }
   0x3   :  { %19 = vsyncpa [#allocation5], 0 }
   0x4   :  { %20 = vsyncpa [#allocation8], 0 }
   0x5   :  { %21 = vsyncpa [#allocation11], 0 }
   0x6   :  { %22 = vsyncpa [#allocation14], 0 }
   0x7   :  { %23 = vsyncpa [#allocation6], 0  ;;  %s42_s21 = sshll.u32 %s1452_s2, 4  ;;  %s43_s21 = int_to_ptr.hbm [resolvable:$true] %s42_s21 }
   0x8   :  { %24 = vsyncpa [#allocation17], 0  ;;  %s1026_s22 = smov [#allocation7]   ;;  %s69_s26 = sshll.u32 %s1454_s4, 4  ;;  %s70_s26 = int_to_ptr.hbm [resolvable:$true] %s69_s26 }
   0x9   :  { %s44_s23 = sshll.u32 %s1026_s22, 4  ;;  %s1027_s9 = smov 128   ;;  %s45_s23 = int_to_ptr.vmem [resolvable:$true] %s44_s23 }
   0xa   :  { %s1028_s27 = smov 8   ;;  %s1029_s28 = smov [#allocation10]  }
   0xb   :  { %50 = dma.hbm_to_vmem [thread:$0]  %s43_s21, 256, %s45_s23, [#allocation8], %s1027_s9, %s1027_s9, %s1028_s27  }
   0xc   :  { %s71_s29 = sshll.u32 %s1029_s28, 4  ;;  %s32_s13 = sshll.u32 %s1451_s1, 4  ;;  %s72_s29 = int_to_ptr.vmem [resolvable:$true] %s71_s29  ;;  %s33_s13 = int_to_ptr.hbm [resolvable:$true] %s32_s13 }
   0xd   :  { %74 = dma.hbm_to_vmem [thread:$0]  %s70_s26, 48, %s72_s29, [#allocation11]  }
   0xe   :  { %s55_s15 = sshll.u32 %s1453_s3, 4  ;;  %s1030_s16 = smov [#allocation4]   ;;  %s56_s15 = int_to_ptr.hbm [resolvable:$true] %s55_s15 }
   0xf   :  { %s34_s17 = sshll.u32 %s1030_s16, 4  ;;  %s1031_s4 = smov [#allocation9]   ;;  %s35_s17 = int_to_ptr.vmem [resolvable:$true] %s34_s17 }
  0x10   :  { %37 = dma.hbm_to_vmem [thread:$0]  %s33_s13, 128, %s35_s17, [#allocation5]  }
  0x11   :  { %s57_s18 = sshll.u32 %s1031_s4, 4  ;;  %s1032_s19 = smov 384   ;;  %s58_s18 = int_to_ptr.vmem [resolvable:$true] %s57_s18 }
  0x12   :  { %s1033_s20 = smov 24   ;;  %s79_s22 = sshll.u32 %s1455_s5, 4  ;;  %s80_s22 = int_to_ptr.hbm [resolvable:$true] %s79_s22 }
  0x13   :  { %63 = dma.hbm_to_vmem [thread:$0]  %s56_s15, 1536, %s58_s18, [#allocation8], %s1032_s19, %s1032_s19, %s1033_s20  }
  0x14   :  { %s1034_s23 = smov [#allocation12]   ;;  %s97_s26 = sshll.u32 %s1458_s8, 4  ;;  %s98_s26 = int_to_ptr.hbm [resolvable:$true] %s97_s26 }
  0x15   :  { %s81_s24 = sshll.u32 %s1034_s23, 4  ;;  %s1035_s9 = smov [#allocation13]   ;;  %s82_s24 = int_to_ptr.vmem [resolvable:$true] %s81_s24 }
  0x16   :  { %87 = dma.hbm_to_vmem [thread:$0]  %s80_s22, 6144, %s82_s24, [#allocation11], %s1032_s19, %s1032_s19, %s1033_s20  }
  0x17   :  { %s99_s27 = sshll.u32 %s1035_s9, 4  ;;  %s100_s27 = int_to_ptr.vmem [resolvable:$true] %s99_s27 }
  0x18   :  { %102 = dma.hbm_to_vmem [thread:$0]  %s98_s26, 16, %s100_s27, [#allocation14]  }
  0x19   :  { %1014 = dma.done.wait [#allocation5], 128  }
  0x1a   :  { %1015 = vsyncadd [#allocation5], 4294967168 }
  0x1b   :  { %1016 = dma.done.wait [#allocation8], 1792  }
  0x1c   :  { %1017 = vsyncadd [#allocation8], 4294965504 }
  0x1d   :  { %1018 = dma.done.wait [#allocation11], 6192  }
  0x1e   :  { %1019 = vsyncadd [#allocation11], 4294961104 }
  0x1f   :  { %1020 = dma.done.wait [#allocation14], 16  }
  0x20   :  { %1021 = vsyncadd [#allocation14], 4294967280  ;;  %v141_v1 = vld [vmem:[#allocation9 + $0x48] sm:$0xff]  ;;  %v138_v3 = vld [vmem:[#allocation9 + $0x30] sm:$0xff]  ;;  %vm152_vm0 = vcmask 261120   ;;  %s728_s17 = sshll.u32 %s1461_s11, 4  ;;  %s729_s17 = int_to_ptr.hbm [resolvable:$true] %s728_s17 }
  0x21   :  { %v1121_v2 = vld [vmem:[#allocation12 + $0x168] sm:$0xff]  ;;  %174 = vmatpush.msra.mxu0 %v141_v1  ;;  %v1124_v4 = vld [vmem:[#allocation12 + $0x150] sm:$0xff]  ;;  %v1126_v6 = vld [vmem:[#allocation12 + $0x138] sm:$0xff]  ;;  %s1038_s4 = smov 32   ;;  %s1039_s18 = smov [#allocation15]  }
  0x22   :  { %302 = vmatpush.msra.mxu3 %v1121_v2  ;;  %v135_v5 = vld [vmem:[#allocation9 + $0x18] sm:$0xff]  ;;  %v132_v7 = vld [vmem:[#allocation9] sm:$0xff]  ;;  %v1134_v10 = vld [vmem:[#allocation12 + $0x108] sm:$0xff]  ;;  %s715_s19 = sshll.u32 %s1039_s18, 4  ;;  %s717_s1 = sshll.u32 %s1460_s10, 4  ;;  %s716_s19 = int_to_ptr.vmem [resolvable:$true] %s715_s19  ;;  %s718_s1 = int_to_ptr.hbm [resolvable:$true] %s717_s1 }
  0x23   :  { %175 = vmatpush.msra.mxu0 %v138_v3  ;;  %v1129_v8 = vld [vmem:[#allocation12 + $0x120] sm:$0xff]  ;;  %v1132_v9 = vld [vmem:[#allocation12 + $0x170] sm:$0xff]  ;;  %v1142_v12 = vld [vmem:[#allocation12 + $0x158] sm:$0xff] }
  0x24   :  { %303 = vmatpush.msra.mxu3 %v1124_v4  ;;  %v1139_v11 = vld [vmem:[%s1450_s0] sm:$0xff]  ;;  %v1145_v13 = vld [vmem:[#allocation12 + $0xf0] sm:$0xff]  ;;  %v1153_v15 = vld [vmem:[#allocation12 + $0xd8] sm:$0xff] }
  0x25   :  { %176 = vmatpush.msra.mxu0 %v135_v5  ;;  %v1148_v14 = vld [vmem:[#allocation12 + $0x140] sm:$0xff]  ;;  %v142_v16 = vld [vmem:[#allocation9 + $0x50] sm:$0xff]  ;;  %v139_v18 = vld [vmem:[#allocation9 + $0x38] sm:$0xff] }
  0x26   :  { %304 = vmatpush.msra.mxu3 %v1126_v6  ;;  %v1156_v17 = vld [vmem:[#allocation12 + $0x128] sm:$0xff]  ;;  %200 = vmatpush.msra.mxu1 %v142_v16  ;;  %v1159_v19 = vld [vmem:[#allocation12 + $0xc0] sm:$0xff]  ;;  %v1162_v21 = vld [vmem:[#allocation12 + $0x110] sm:$0xff] }
  0x27   :  { %177 = vmatpush.msra.mxu0 %v132_v7  ;;  %v136_v20 = vld [vmem:[#allocation9 + $0x20] sm:$0xff]  ;;  %v1165_v22 = vld [vmem:[#allocation12 + $0xa8] sm:$0xff]  ;;  %v1176_v26 = vld [vmem:[#allocation12 + $0x90] sm:$0xff] }
  0x28   :  { %305 = vmatpush.msra.mxu3 %v1129_v8  ;;  %746 = vmatmul.msk.f32.vlgmr.msra.gmra.mxu0 %vm152_vm0, %v1139_v11  ;;  %v1170_v23 = vld [vmem:[%s1450_s0 + $0x8] sm:$0xff]  ;;  %v1173_v24 = vld [vmem:[#allocation12 + $0xf8] sm:$0xff]  ;;  %v1181_v28 = vld [vmem:[#allocation12 + $0xe0] sm:$0xff] }
  0x29   :  { %322 = vmatpush.msrb.mxu0 %v1132_v9  ;;  %201 = vmatpush.msra.mxu1 %v139_v18  ;;  %v133_v25 = vld [vmem:[#allocation9 + $0x8] sm:$0xff]  ;;  %v1178_v27 = vld [vmem:[#allocation12 + $0x178] sm:$0xff]  ;;  %v1197_v34 = vld [vmem:[#allocation12 + $0xb0] sm:$0xff] }
  0x2a   :  { %306 = vmatpush.msra.mxu3 %v1134_v10  ;;  %v1186_v29 = vld [vmem:[#allocation12 + $0x78] sm:$0xff]  ;;  %v1188_v30 = vld [vmem:[#allocation12 + $0x160] sm:$0xff]  ;;  %v1191_v31 = vld [vmem:[#allocation12 + $0xc8] sm:$0xff] }
  0x2b   :  { %323 = vmatpush.msrb.mxu0 %v1142_v12  ;;  %202 = vmatpush.msra.mxu1 %v136_v20  ;;  %v143_v32 = vld [vmem:[#allocation9 + $0x58] sm:$0xff]  ;;  %v1195_v33 = vld [vmem:[#allocation12 + $0x60] sm:$0xff]  ;;  %v1201_v35 = vld [vmem:[#allocation12 + $0x148] sm:$0xff] }
  0x2c   :  { %307 = vmatpush.msra.mxu3 %v1145_v13  ;;  %v1204_v36 = vld [vmem:[#allocation12 + $0x48] sm:$0xff]  ;;  %v140_v37 = vld [vmem:[#allocation9 + $0x40] sm:$0xff]  ;;  %v1211_v38 = vld [vmem:[%s1450_s0 + $0x10] sm:$0xff]  ;;  %226 = vmatpush.msra.mxu2 %v143_v32 }
  0x2d   :  { %324 = vmatpush.msrb.mxu0 %v1148_v14  ;;  %203 = vmatpush.msra.mxu1 %v133_v25  ;;  %v1214_v39 = vld [vmem:[#allocation12 + $0x98] sm:$0xff]  ;;  %v1217_v40 = vld [vmem:[#allocation12 + $0x130] sm:$0xff]  ;;  %v137_v42 = vld [vmem:[#allocation9 + $0x28] sm:$0xff] }
  0x2e   :  { %308 = vmatpush.msra.mxu3 %v1153_v15  ;;  %749 = vmatmul.msk.f32.vlgmr.msra.gmra.mxu1 %vm152_vm0, %v1139_v11  ;;  %v1220_v41 = vld [vmem:[#allocation12 + $0x30] sm:$0xff]  ;;  %v1223_v43 = vld [vmem:[#allocation12 + $0x80] sm:$0xff]  ;;  %v1227_v44 = vld [vmem:[#allocation12 + $0x118] sm:$0xff] }
  0x2f   :  { %325 = vmatpush.msrb.mxu0 %v1156_v17  ;;  %342 = vmatpush.msrb.mxu1 %v1178_v27  ;;  %v1230_v45 = vld [vmem:[#allocation12 + $0x18] sm:$0xff]  ;;  %v1234_v46 = vld [vmem:[#allocation12 + $0x68] sm:$0xff]  ;;  %v1236_v47 = vld [vmem:[#allocation12 + $0x100] sm:$0xff] }
  0x30   :  { %309 = vmatpush.msra.mxu3 %v1159_v19  ;;  %747 = vmatmul.msk.f32.gmra.mxu0 %vm152_vm0, %v1170_v23  ;;  %v1239_v48 = vld [vmem:[#allocation12] sm:$0xff]  ;;  %v134_v49 = vld [vmem:[#allocation9 + $0x10] sm:$0xff]  ;;  %v1254_v53 = vld [vmem:[#allocation12 + $0x38] sm:$0xff] }
  0x31   :  { %326 = vmatpush.msrb.mxu0 %v1162_v21  ;;  %343 = vmatpush.msrb.mxu1 %v1188_v30  ;;  %v1243_v50 = vld [vmem:[#allocation4] sm:$0xff]  ;;  %v1245_v51 = vld [vmem:[#allocation12 + $0x50] sm:$0xff]  ;;  %v1266_v56 = vld [vmem:[#allocation12 + $0xb8] sm:$0xff] }
  0x32   :  { %310 = vmatpush.msra.mxu3 %v1165_v22  ;;  %227 = vmatpush.msra.mxu2 %v140_v37  ;;  %v1251_v52 = vld [vmem:[#allocation12 + $0xe8] sm:$0xff]  ;;  %v1258_v54 = vld [vmem:[#allocation12 + $0xd0] sm:$0xff]  ;;  %v1260_v55 = vld [vmem:[#allocation12 + $0x20] sm:$0xff] }
  0x33   :  { %327 = vmatpush.msrb.mxu0 %v1173_v24  ;;  %344 = vmatpush.msrb.mxu1 %v1201_v35  ;;  %v1269_v57 = vld [vmem:[#allocation12 + $0x8] sm:$0xff]  ;;  %v1274_v58 = vld [vmem:[#allocation12 + $0xa0] sm:$0xff]  ;;  %v1286_v60 = vld [vmem:[#allocation12 + $0x70] sm:$0xff] }
  0x34   :  { %311 = vmatpush.msra.mxu3 %v1176_v26  ;;  %228 = vmatpush.msra.mxu2 %v137_v42  ;;  %v1280_v59 = vld [vmem:[#allocation12 + $0x88] sm:$0xff]  ;;  %v1292_v61 = vld [vmem:[#allocation12 + $0x58] sm:$0xff]  ;;  %v1298_v62 = vld [vmem:[#allocation12 + $0x40] sm:$0xff] }
  0x35   :  { %328 = vmatpush.msrb.mxu0 %v1181_v28  ;;  %345 = vmatpush.msrb.mxu1 %v1217_v40  ;;  %v1304_v63 = vld [vmem:[#allocation12 + $0x28] sm:$0xff]  ;;  %v1310_v0 = vld [vmem:[#allocation12 + $0x10] sm:$0xff] }
  0x36   :  { %312 = vmatpush.msra.mxu3 %v1186_v29  ;;  %750 = vmatmul.msk.f32.gmra.mxu1 %vm152_vm0, %v1170_v23 }
  0x37   :  { %329 = vmatpush.msrb.mxu0 %v1191_v31  ;;  %346 = vmatpush.msrb.mxu1 %v1227_v44 }
  0x38   :  { %313 = vmatpush.msra.mxu3 %v1195_v33  ;;  %748 = vmatmul.msk.f32.gmra.mxu0 %vm152_vm0, %v1211_v38 }
  0x39   :  { %330 = vmatpush.msrb.mxu0 %v1197_v34  ;;  %347 = vmatpush.msrb.mxu1 %v1236_v47 }
  0x3a   :  { %314 = vmatpush.msra.mxu3 %v1204_v36  ;;  %229 = vmatpush.msra.mxu2 %v134_v49 }
  0x3b   :  { %331 = vmatpush.msrb.mxu0 %v1214_v39  ;;  %348 = vmatpush.msrb.mxu1 %v1251_v52 }
  0x3c   :  { %315 = vmatpush.msra.mxu3 %v1220_v41  ;;  %752 = vmatmul.msk.f32.vlgmr.msra.gmra.mxu2 %vm152_vm0, %v1139_v11 }
  0x3d   :  { %332 = vmatpush.msrb.mxu0 %v1223_v43  ;;  %416 = vmatpush.msrb.mxu2 %v1121_v2 }
  0x3e   :  { %316 = vmatpush.msra.mxu3 %v1230_v45  ;;  %349 = vmatpush.msrb.mxu1 %v1258_v54 }
  0x3f   :  { %333 = vmatpush.msrb.mxu0 %v1234_v46  ;;  %417 = vmatpush.msrb.mxu2 %v1124_v4 }
  0x40   :  { %317 = vmatpush.msra.mxu3 %v1239_v48  ;;  %350 = vmatpush.msrb.mxu1 %v1266_v56 }
  0x41   :  { %318 = vmatmul.f32.vlgmr.msra.gmra.mxu3 %v1243_v50  ;;  %334 = vmatpush.msrb.mxu0 %v1245_v51 }
  0x42   :  { %436 = vmatpush.msrb.mxu3 %v1132_v9  ;;  %751 = vmatmul.msk.f32.gmra.mxu1 %vm152_vm0, %v1211_v38 }
  0x43   :  { %335 = vmatpush.msrb.mxu0 %v1254_v53  ;;  %351 = vmatpush.msrb.mxu1 %v1274_v58 }
  0x44   :  { %437 = vmatpush.msrb.mxu3 %v1142_v12  ;;  %418 = vmatpush.msrb.mxu2 %v1126_v6 }
  0x45   :  { %336 = vmatpush.msrb.mxu0 %v1260_v55  ;;  %352 = vmatpush.msrb.mxu1 %v1280_v59 }
  0x46   :  { %438 = vmatpush.msrb.mxu3 %v1148_v14  ;;  %419 = vmatpush.msrb.mxu2 %v1129_v8 }
  0x47   :  { %337 = vmatpush.msrb.mxu0 %v1269_v57  ;;  %353 = vmatpush.msrb.mxu1 %v1286_v60 }
  0x48   :  { %338 = vmatmul.f32.vlgmr.msrb.gmra.mxu0 %v1243_v50  ;;  %439 = vmatpush.msrb.mxu3 %v1156_v17 }
  0x49   :  { %456 = vmatpush.msra.mxu0 %v1178_v27  ;;  %420 = vmatpush.msrb.mxu2 %v1134_v10 }
  0x4a   :  { %354 = vmatpush.msrb.mxu1 %v1292_v61  ;;  %440 = vmatpush.msrb.mxu3 %v1162_v21 }
  0x4b   :  { %457 = vmatpush.msra.mxu0 %v1188_v30  ;;  %421 = vmatpush.msrb.mxu2 %v1145_v13 }
  0x4c   :  { %355 = vmatpush.msrb.mxu1 %v1298_v62  ;;  %441 = vmatpush.msrb.mxu3 %v1173_v24 }
  0x4d   :  { %458 = vmatpush.msra.mxu0 %v1201_v35  ;;  %422 = vmatpush.msrb.mxu2 %v1153_v15 }
  0x4e   :  { %356 = vmatpush.msrb.mxu1 %v1304_v63  ;;  %442 = vmatpush.msrb.mxu3 %v1181_v28 }
  0x4f   :  { %459 = vmatpush.msra.mxu0 %v1217_v40  ;;  %423 = vmatpush.msrb.mxu2 %v1159_v19 }
  0x50   :  { %357 = vmatpush.msrb.mxu1 %v1310_v0  ;;  %443 = vmatpush.msrb.mxu3 %v1191_v31 }
  0x51   :  { %460 = vmatpush.msra.mxu0 %v1227_v44  ;;  %358 = vmatmul.f32.vlgmr.msrb.gmra.mxu1 %v1243_v50 }
  0x52   :  { %753 = vmatmul.msk.f32.gmra.mxu2 %vm152_vm0, %v1170_v23  ;;  %444 = vmatpush.msrb.mxu3 %v1197_v34 }
  0x53   :  { %461 = vmatpush.msra.mxu0 %v1236_v47  ;;  %424 = vmatpush.msrb.mxu2 %v1165_v22 }
  0x54   :  { %445 = vmatpush.msrb.mxu3 %v1214_v39  ;;  %527 = vmatpush.msra.mxu1 %v1121_v2  ;;  %v144_v2 = vld [vmem:[#allocation10] sm:$0x7] }
  0x55   :  { %462 = vmatpush.msra.mxu0 %v1251_v52  ;;  %425 = vmatpush.msrb.mxu2 %v1176_v26  ;;  %v146_v3 = vperm.slane %v144_v2, 0  ;;  %v1412_v37 = vperm.slane %v144_v2, 2 }
  0x56   :  { %446 = vmatpush.msrb.mxu3 %v1223_v43  ;;  %528 = vmatpush.msra.mxu1 %v1124_v4 }
  0x57   :  { %463 = vmatpush.msra.mxu0 %v1258_v54  ;;  %426 = vmatpush.msrb.mxu2 %v1186_v29 }
  0x58   :  { %447 = vmatpush.msrb.mxu3 %v1234_v46  ;;  %529 = vmatpush.msra.mxu1 %v1126_v6 }
  0x59   :  { %464 = vmatpush.msra.mxu0 %v1266_v56  ;;  %427 = vmatpush.msrb.mxu2 %v1195_v33 }
  0x5a   :  { %754 = vmatmul.msk.f32.gmra.mxu2 %vm152_vm0, %v1211_v38  ;;  %448 = vmatpush.msrb.mxu3 %v1245_v51 }
  0x5b   :  { %465 = vmatpush.msra.mxu0 %v1274_v58  ;;  %428 = vmatpush.msrb.mxu2 %v1204_v36 }
  0x5c   :  { %449 = vmatpush.msrb.mxu3 %v1254_v53  ;;  %530 = vmatpush.msra.mxu1 %v1129_v8 }
  0x5d   :  { %466 = vmatpush.msra.mxu0 %v1280_v59  ;;  %429 = vmatpush.msrb.mxu2 %v1220_v41 }
  0x5e   :  { %450 = vmatpush.msrb.mxu3 %v1260_v55  ;;  %531 = vmatpush.msra.mxu1 %v1134_v10 }
  0x5f   :  { %467 = vmatpush.msra.mxu0 %v1286_v60  ;;  %430 = vmatpush.msrb.mxu2 %v1230_v45 }
  0x60   :  { %451 = vmatpush.msrb.mxu3 %v1269_v57  ;;  %532 = vmatpush.msra.mxu1 %v1145_v13 }
  0x61   :  { %468 = vmatpush.msra.mxu0 %v1292_v61  ;;  %431 = vmatpush.msrb.mxu2 %v1239_v48 }
  0x62   :  { %567 = vmatpush.msra.mxu3 %v1178_v27  ;;  %533 = vmatpush.msra.mxu1 %v1153_v15 }
  0x63   :  { %469 = vmatpush.msra.mxu0 %v1298_v62  ;;  %547 = vmatpush.msra.mxu2 %v1132_v9  ;;  %v147_v9 = vperm.slane %v144_v2, 1 }
  0x64   :  { %568 = vmatpush.msra.mxu3 %v1188_v30  ;;  %534 = vmatpush.msra.mxu1 %v1159_v19 }
  0x65   :  { %470 = vmatpush.msra.mxu0 %v1304_v63  ;;  %548 = vmatpush.msra.mxu2 %v1142_v12 }
  0x66   :  { %569 = vmatpush.msra.mxu3 %v1201_v35  ;;  %535 = vmatpush.msra.mxu1 %v1165_v22 }
  0x67   :  { %471 = vmatpush.msra.mxu0 %v1310_v0  ;;  %549 = vmatpush.msra.mxu2 %v1148_v14 }
  0x68   :  { %570 = vmatpush.msra.mxu3 %v1217_v40  ;;  %536 = vmatpush.msra.mxu1 %v1176_v26 }
  0x69   :  { %550 = vmatpush.msra.mxu2 %v1156_v17 }
  0x6a   :  { %571 = vmatpush.msra.mxu3 %v1227_v44  ;;  %537 = vmatpush.msra.mxu1 %v1186_v29 }
  0x6b   :  { %551 = vmatpush.msra.mxu2 %v1162_v21 }
  0x6c   :  { %572 = vmatpush.msra.mxu3 %v1236_v47  ;;  %538 = vmatpush.msra.mxu1 %v1195_v33 }
  0x6d   :  { %552 = vmatpush.msra.mxu2 %v1173_v24 }
  0x6e   :  { %573 = vmatpush.msra.mxu3 %v1251_v52  ;;  %539 = vmatpush.msra.mxu1 %v1204_v36 }
  0x6f   :  { %553 = vmatpush.msra.mxu2 %v1181_v28 }
  0x70   :  { %574 = vmatpush.msra.mxu3 %v1258_v54  ;;  %540 = vmatpush.msra.mxu1 %v1220_v41 }
  0x71   :  { %554 = vmatpush.msra.mxu2 %v1191_v31  ;;  %v1410_v31 = vld [vmem:[%s1456_s6] ss:$0 sm:$0xff] }
  0x72   :  { %575 = vmatpush.msra.mxu3 %v1266_v56  ;;  %541 = vmatpush.msra.mxu1 %v1230_v45 }
  0x73   :  { %555 = vmatpush.msra.mxu2 %v1197_v34 }
  0x74   :  { %576 = vmatpush.msra.mxu3 %v1274_v58  ;;  %542 = vmatpush.msra.mxu1 %v1239_v48 }
  0x75   :  { %556 = vmatpush.msra.mxu2 %v1214_v39 }
  0x76   :  { %577 = vmatpush.msra.mxu3 %v1280_v59 }
  0x77   :  { %557 = vmatpush.msra.mxu2 %v1223_v43 }
  0x78   :  { %578 = vmatpush.msra.mxu3 %v1286_v60 }
  0x79   :  { %558 = vmatpush.msra.mxu2 %v1234_v46 }
  0x7a   :  { %579 = vmatpush.msra.mxu3 %v1292_v61 }
  0x7b   :  { %559 = vmatpush.msra.mxu2 %v1245_v51 }
  0x7c   :  { %580 = vmatpush.msra.mxu3 %v1298_v62 }
  0x7d   :  { %560 = vmatpush.msra.mxu2 %v1254_v53 }
  0x7e   :  { %581 = vmatpush.msra.mxu3 %v1304_v63 }
  0x7f   :  { %561 = vmatpush.msra.mxu2 %v1260_v55 }
  0x80   :  { %582 = vmatpush.msra.mxu3 %v1310_v0 }
  0x81   :  { %562 = vmatpush.msra.mxu2 %v1269_v57 }
  0xa5   :  { %v179_v1 = vpop.f32.mrf.mxu0 }
  0xa6   :  { %v180_v13 = vadd.f32 %v179_v1, %v146_v3 }
  0xab   :  { %v205_v6 = vpop.f32.mrf.mxu1 }
  0xac   :  { %v206_v12 = vadd.f32 %v205_v6, %v147_v9 }
  0xad   :  { %v182_v4 = vpop.f32.mrf.mxu0 }
  0xae   :  { %v1399_v5 = vadd.f32 %v182_v4, %v146_v3 }
  0xb3   :  { %v208_v10 = vpop.f32.mrf.mxu1 }
  0xb4   :  { %v1403_v11 = vadd.f32 %v208_v10, %v147_v9 }
  0xb5   :  { %v185_v7 = vpop.f32.mrf.mxu0 }
  0xb6   :  { %v1401_v8 = vadd.f32 %v185_v7, %v146_v3 }
  0xbf   :  { %v211_v15 = vpop.f32.mrf.mxu1  ;;  %v231_v39 = vpop.f32.mrf.mxu2 }
  0xc0   :  { %v1405_v18 = vadd.f32 %v211_v15, %v147_v9  ;;  %v232_v44 = vadd.f32 %v231_v39, %v1412_v37 }
  0xc4   :  { %v319_v14 = vpop.f32.mrf.mxu3 }
  0xc5   :  { %v362_v16 = vadd.f32 %v319_v14, %v180_v13  ;;  %v339_v17 = vpop.f32.mrf.mxu0 }
  0xc6   :  { %v382_v19 = vadd.f32 %v339_v17, %v206_v12 }
  0xc7   :  { %v755_v20 = vmul.f32 -1.442695, %v362_v16 }
  0xc8   :  { %v756_v21 = vmul.f32 -1.442695, %v382_v19 }
  0xc9   :  { %782 = vpow2.f32 %v755_v20 }
  0xca   :  { %784 = vpow2.f32 %v756_v21 }
  0xce   :  { %v359_v33 = vpop.f32.mrf.mxu1 }
  0xcf   :  { %v783_v22 = vpop.eup %782  ;;  %v405_v41 = vadd.f32 %v1410_v31, %v359_v33 }
  0xd0   :  { %v785_v23 = vpop.eup %784  ;;  %v366_v24 = vadd.f32 1.0, %v783_v22 }
  0xd1   :  { %v386_v25 = vadd.f32 1.0, %v785_v23 }
  0xd2   :  { %786 = vrcp.f32 %v366_v24  ;;  %v378_v34 = vand.u32 2147483648, %v366_v24  ;;  %v376_v36 = vand.u32 2147483647, %v366_v24  ;;  %vm372_vm2 = vweird.f32 %v366_v24 }
  0xd3   :  { %788 = vrcp.f32 %v386_v25  ;;  %v398_v48 = vand.u32 2147483648, %v386_v25  ;;  %vm392_vm6 = vweird.f32 %v386_v25  ;;  %v396_v49 = vand.u32 2147483647, %v386_v25 }
  0xd4   :  { %v379_v42 = vor.u32 1.1754944e-38, %v378_v34  ;;  %vm377_vm4 = vcmp.eq.f32.partialorder %v376_v36, 8.507059e+37 }
  0xd5   :  { %v399_v53 = vor.u32 1.1754944e-38, %v398_v48  ;;  %vm397_vm8 = vcmp.eq.f32.partialorder %v396_v49, 8.507059e+37  ;;  %v234_v60 = vpop.f32.mrf.mxu2  ;;  %v780_v49 = vld [vmem:[%s1457_s7] ss:$0 sm:$0xff]  ;;  %s1037_s7 = smov [#allocation16]  }
  0xd6   :  { %s726_s14 = sshll.u32 %s1037_s7, 4  ;;  %s727_s14 = int_to_ptr.vmem [resolvable:$true] %s726_s14 }
  0xd8   :  { %v787_v26 = vpop.eup %786 }
  0xd9   :  { %v789_v27 = vpop.eup %788  ;;  %v368_v28 = vmul.f32 %v787_v26, %v366_v24  ;;  %vm373_vm1 = vweird.f32 %v787_v26 }
  0xda   :  { %v388_v29 = vmul.f32 %v789_v27, %v386_v25  ;;  %vm374_vm3 = vmor %vm372_vm2, %vm373_vm1  ;;  %vm393_vm5 = vweird.f32 %v789_v27  ;;  %vm656_vm2 = vcmask 130048  }
  0xdb   :  { %v369_v30 = vsub.f32 1.0, %v368_v28  ;;  %vm394_vm7 = vmor %vm392_vm6, %vm393_vm5 }
  0xdc   :  { %v389_v32 = vsub.f32 1.0, %v388_v29 }
  0xdd   :  { %v370_v35 = vmul.f32 %v787_v26, %v369_v30  ;;  %v1417_v61 = vpop.f32.mrf.mxu2 }
  0xde   :  { %v390_v38 = vmul.f32 %v789_v27, %v389_v32 }
  0xdf   :  { %v371_v40 = vadd.f32 %v787_v26, %v370_v35 }
  0xe0   :  { %v391_v46 = vadd.f32 %v789_v27, %v390_v38 }
  0xe1   :  { %v375_v43 = vsel %vm374_vm3, %v787_v26, %v371_v40  ;;  %v235_v26 = vadd.f32 %v234_v60, %v1412_v37 }
  0xe2   :  { %v380_v45 = vsel %vm377_vm4, %v379_v42, %v375_v43  ;;  %v395_v52 = vsel %vm394_vm7, %v789_v27, %v391_v46 }
  0xe3   :  { %v406_v47 = vmul.f32 %v405_v41, %v380_v45  ;;  %v400_v54 = vsel %vm397_vm8, %v399_v53, %v395_v52 }
  0xe4   :  { %v409_v55 = vsub.f32 1.0, %v400_v54  ;;  %v411_v58 = vmul.f32 %v400_v54, %v1243_v50 }
  0xe5   :  { %v407_v51 = vadd.f32 %v406_v47, %v232_v44 }
  0xe7   :  { %790 = vtanh.f32 %v407_v51  ;;  %v1428_v51 = vld [vmem:[#allocation7 + $0x8] sm:$0xff] }
  0xed   :  { %v791_v56 = vpop.eup %790 }
  0xee   :  { %v410_v57 = vmul.f32 %v791_v56, %v409_v55 }
  0xf0   :  { %v412_v59 = vadd.f32 %v411_v58, %v410_v57 }
  0xf2   :  { %432 = vmatmul.f32.vlgmr.msrb.gmra.mxu2 %v412_v59  ;;  %452 = vmatmul.f32.vlgmr.msrb.gmra.mxu3 %v412_v59 }
  0xf3   :  { %472 = vmatmul.f32.vlgmr.msra.gmra.mxu0 %v412_v59 }
 0x170   :  { %v473_v17 = vpop.f32.mrf.mxu0 }
 0x171   :  { %v516_v22 = vadd.f32 %v1410_v31, %v473_v17 }
 0x175   :  { %v433_v62 = vpop.f32.mrf.mxu2  ;;  %v453_v63 = vpop.f32.mrf.mxu3 }
 0x176   :  { %v476_v0 = vadd.f32 %v433_v62, %v1399_v5  ;;  %v496_v1 = vadd.f32 %v453_v63, %v1403_v11 }
 0x178   :  { %v757_v2 = vmul.f32 -1.442695, %v476_v0  ;;  %v758_v3 = vmul.f32 -1.442695, %v496_v1 }
 0x17a   :  { %792 = vpow2.f32 %v757_v2 }
 0x17b   :  { %794 = vpow2.f32 %v758_v3 }
 0x180   :  { %v793_v4 = vpop.eup %792 }
 0x181   :  { %v795_v6 = vpop.eup %794  ;;  %v480_v50 = vadd.f32 1.0, %v793_v4 }
 0x182   :  { %v500_v7 = vadd.f32 1.0, %v795_v6  ;;  %v238_v6 = vadd.f32 %v1417_v61, %v1412_v37  ;;  %v779_v37 = vld [vmem:[#allocation13] ss:$0 sm:$0xff] }
 0x183   :  { %796 = vrcp.f32 %v480_v50  ;;  %v492_v15 = vand.u32 2147483648, %v480_v50  ;;  %v490_v11 = vand.u32 2147483647, %v480_v50  ;;  %vm486_vm10 = vweird.f32 %v480_v50 }
 0x184   :  { %798 = vrcp.f32 %v500_v7  ;;  %v512_v27 = vand.u32 2147483648, %v500_v7  ;;  %vm506_vm14 = vweird.f32 %v500_v7  ;;  %v510_v29 = vand.u32 2147483647, %v500_v7 }
 0x185   :  { %v493_v21 = vor.u32 1.1754944e-38, %v492_v15  ;;  %vm491_vm12 = vcmp.eq.f32.partialorder %v490_v11, 8.507059e+37 }
 0x186   :  { %v513_v33 = vor.u32 1.1754944e-38, %v512_v27  ;;  %vm511_vm1 = vcmp.eq.f32.partialorder %v510_v29, 8.507059e+37 }
 0x189   :  { %v797_v9 = vpop.eup %796 }
 0x18a   :  { %v799_v10 = vpop.eup %798  ;;  %v482_v12 = vmul.f32 %v797_v9, %v480_v50  ;;  %vm487_vm9 = vweird.f32 %v797_v9 }
 0x18b   :  { %v502_v13 = vmul.f32 %v799_v10, %v500_v7  ;;  %vm488_vm11 = vmor %vm486_vm10, %vm487_vm9  ;;  %vm507_vm13 = vweird.f32 %v799_v10 }
 0x18c   :  { %v483_v14 = vsub.f32 1.0, %v482_v12  ;;  %vm508_vm15 = vmor %vm506_vm14, %vm507_vm13 }
 0x18d   :  { %v503_v16 = vsub.f32 1.0, %v502_v13 }
 0x18e   :  { %v484_v5 = vmul.f32 %v797_v9, %v483_v14 }
 0x18f   :  { %v504_v19 = vmul.f32 %v799_v10, %v503_v16 }
 0x190   :  { %v485_v20 = vadd.f32 %v797_v9, %v484_v5 }
 0x191   :  { %v505_v25 = vadd.f32 %v799_v10, %v504_v19 }
 0x192   :  { %v489_v23 = vsel %vm488_vm11, %v797_v9, %v485_v20 }
 0x193   :  { %v494_v24 = vsel %vm491_vm12, %v493_v21, %v489_v23  ;;  %v509_v32 = vsel %vm508_vm15, %v799_v10, %v505_v25  ;;  %v636_v21 = vld [vmem:[#allocation7] sm:$0xff]  ;;  %v781_v25 = vld [vmem:[#allocation3] ss:$0 sm:$0xff]  ;;  %vm708_vm15 = vcmask 392192  }
 0x194   :  { %v517_v28 = vmul.f32 %v516_v22, %v494_v24  ;;  %v514_v34 = vsel %vm511_vm1, %v513_v33, %v509_v32  ;;  %v655_v23 = vmul.f32 %v780_v49, %v636_v21 }
 0x195   :  { %v520_v35 = vsub.f32 1.0, %v514_v34  ;;  %v522_v39 = vmul.f32 %v514_v34, %v412_v59 }
 0x196   :  { %v518_v30 = vadd.f32 %v517_v28, %v235_v26  ;;  %v657_v24 = vsel %vm656_vm2, %v655_v23, 0.0  ;;  %v1036_v28 = vmov 0  }
 0x197   :  { %776 = vset.pattern.permute.xlu2 %v1036_v28  ;;  %775 = vset.pattern.permute.xlu1 %v1036_v28 }
 0x198   :  { %800 = vtanh.f32 %v518_v30  ;;  %777 = vset.pattern.permute.xlu0 %v1036_v28 }
 0x19e   :  { %v801_v36 = vpop.eup %800 }
 0x19f   :  { %v521_v38 = vmul.f32 %v801_v36, %v520_v35 }
 0x1a1   :  { %v523_v40 = vadd.f32 %v522_v39, %v521_v38 }
 0x1a3   :  { %543 = vmatmul.f32.vlgmr.msra.gmra.mxu1 %v523_v40  ;;  %563 = vmatmul.f32.vlgmr.msra.gmra.mxu2 %v523_v40 }
 0x1a4   :  { %583 = vmatmul.f32.vlgmr.msra.gmra.mxu3 %v523_v40 }
 0x220   :  { %v544_v41 = vpop.f32.mrf.mxu1 }
 0x221   :  { %v587_v42 = vadd.f32 %v544_v41, %v1401_v8  ;;  %v660_v8 = vmul.f32 %v780_v49, %v1428_v51 }
 0x223   :  { %v759_v43 = vmul.f32 -1.442695, %v587_v42  ;;  %v661_v54 = vsel %vm656_vm2, %v660_v8, 0.0 }
 0x224   :  { %662 = vadd.xlane.f32.xlu1 %v661_v54 }
 0x225   :  { %802 = vpow2.f32 %v759_v43 }
 0x226   :  { %v564_v44 = vpop.f32.mrf.mxu2 }
 0x227   :  { %v607_v45 = vadd.f32 %v564_v44, %v1405_v18  ;;  %v584_v62 = vpop.f32.mrf.mxu3 }
 0x228   :  { %v627_v4 = vadd.f32 %v1410_v31, %v584_v62 }
 0x229   :  { %v760_v46 = vmul.f32 -1.442695, %v607_v45 }
 0x22b   :  { %v803_v47 = vpop.eup %802  ;;  %804 = vpow2.f32 %v760_v46 }
 0x22c   :  { %v591_v48 = vadd.f32 1.0, %v803_v47 }
 0x22e   :  { %806 = vrcp.f32 %v591_v48  ;;  %v603_v57 = vand.u32 2147483648, %v591_v48  ;;  %v601_v59 = vand.u32 2147483647, %v591_v48  ;;  %vm597_vm4 = vweird.f32 %v591_v48 }
 0x230   :  { %v604_v1 = vor.u32 1.1754944e-38, %v603_v57  ;;  %vm602_vm6 = vcmp.eq.f32.partialorder %v601_v59, 8.507059e+37 }
 0x231   :  { %v805_v52 = vpop.eup %804 }
 0x232   :  { %v611_v53 = vadd.f32 1.0, %v805_v52 }
 0x234   :  { %v807_v55 = vpop.eup %806  ;;  %808 = vrcp.f32 %v611_v53  ;;  %v623_v10 = vand.u32 2147483648, %v611_v53  ;;  %v621_v12 = vand.u32 2147483647, %v611_v53  ;;  %vm617_vm8 = vweird.f32 %v611_v53 }
 0x235   :  { %v593_v18 = vmul.f32 %v807_v55, %v591_v48  ;;  %vm598_vm3 = vweird.f32 %v807_v55 }
 0x236   :  { %vm599_vm5 = vmor %vm597_vm4, %vm598_vm3  ;;  %v624_v16 = vor.u32 1.1754944e-38, %v623_v10  ;;  %vm622_vm10 = vcmp.eq.f32.partialorder %v621_v12, 8.507059e+37 }
 0x237   :  { %v594_v56 = vsub.f32 1.0, %v593_v18 }
 0x239   :  { %v595_v58 = vmul.f32 %v807_v55, %v594_v56 }
 0x23a   :  { %v809_v60 = vpop.eup %808 }
 0x23b   :  { %v613_v63 = vmul.f32 %v809_v60, %v611_v53  ;;  %v596_v0 = vadd.f32 %v807_v55, %v595_v58  ;;  %vm618_vm7 = vweird.f32 %v809_v60 }
 0x23c   :  { %vm619_vm9 = vmor %vm617_vm8, %vm618_vm7 }
 0x23d   :  { %v614_v2 = vsub.f32 1.0, %v613_v63  ;;  %v600_v3 = vsel %vm599_vm5, %v807_v55, %v596_v0 }
 0x23e   :  { %v605_v50 = vsel %vm602_vm6, %v604_v1, %v600_v3 }
 0x23f   :  { %v628_v7 = vmul.f32 %v627_v4, %v605_v50  ;;  %v615_v9 = vmul.f32 %v809_v60, %v614_v2 }
 0x241   :  { %v629_v13 = vadd.f32 %v628_v7, %v238_v6  ;;  %v616_v14 = vadd.f32 %v809_v60, %v615_v9 }
 0x243   :  { %810 = vtanh.f32 %v629_v13  ;;  %v620_v15 = vsel %vm619_vm9, %v809_v60, %v616_v14 }
 0x244   :  { %v625_v5 = vsel %vm622_vm10, %v624_v16, %v620_v15 }
 0x245   :  { %v631_v11 = vsub.f32 1.0, %v625_v5  ;;  %v633_v19 = vmul.f32 %v625_v5, %v523_v40 }
 0x249   :  { %v811_v31 = vpop.eup %810 }
 0x24a   :  { %v632_v17 = vmul.f32 %v811_v31, %v631_v11 }
 0x24c   :  { %v1435_v61 = vadd.f32 %v633_v19, %v632_v17 }
 0x24e   :  { %v642_v20 = vmul.f32 %v779_v37, %v1435_v61  ;;  %635 = vst [vmem:[#allocation16] sm:$0xff] %v1435_v61 }
 0x24f   :  { %731 = dma.vmem_to_hbm [thread:$0]  %s727_s14, 128, %s729_s17, [#allocation17]  }
 0x250   :  { %v643_v22 = vsel %vm152_vm0, %v642_v20, 0.0 }
 0x251   :  { %644 = vadd.xlane.f32.xlu0 %v643_v22 }
 0x259   :  { %658 = vadd.xlane.f32.xlu0 %v657_v24 }
 0x297   :  { %v663_v27 = vpop.xlane.xlu1 %662 }
 0x2c4   :  { %v645_v26 = vpop.xlane.xlu0 %644 }
 0x2c5   :  { %v650_v29 = vadd.f32 %v781_v25, %v645_v26 }
 0x2c7   :  { %v668_v30 = vadd.f32 %v663_v27, %v650_v29 }
 0x2c9   :  { %812 = vtanh.f32 %v668_v30 }
 0x2cc   :  { %v659_v32 = vpop.xlane.xlu0 %658 }
 0x2cd   :  { %v664_v33 = vadd.f32 %v659_v32, %v650_v29 }
 0x2cf   :  { %814 = vtanh.f32 %v664_v33  ;;  %v813_v34 = vpop.eup %812 }
 0x2d0   :  { %v670_v35 = vmul.f32 1.442695, %v813_v34 }
 0x2d2   :  { %816 = vpow2.f32 %v670_v35 }
 0x2d5   :  { %v815_v36 = vpop.eup %814 }
 0x2d6   :  { %v666_v38 = vmul.f32 1.442695, %v815_v36 }
 0x2d8   :  { %818 = vpow2.f32 %v666_v38  ;;  %v817_v39 = vpop.eup %816 }
 0x2de   :  { %v819_v40 = vpop.eup %818 }
 0x2df   :  { %v672_v41 = vadd.f32 %v819_v40, %v817_v39 }
 0x2e1   :  { %v673_v42 = vadd.f32 1e-06, %v672_v41 }
 0x2e3   :  { %820 = vrcp.f32 %v673_v42  ;;  %v685_v46 = vand.u32 2147483648, %v673_v42  ;;  %v683_v48 = vand.u32 2147483647, %v673_v42  ;;  %vm679_vm12 = vweird.f32 %v673_v42 }
 0x2e5   :  { %v686_v52 = vor.u32 1.1754944e-38, %v685_v46  ;;  %vm684_vm14 = vcmp.eq.f32.partialorder %v683_v48, 8.507059e+37 }
 0x2e9   :  { %v821_v43 = vpop.eup %820 }
 0x2ea   :  { %v675_v44 = vmul.f32 %v821_v43, %v673_v42  ;;  %vm680_vm11 = vweird.f32 %v821_v43 }
 0x2eb   :  { %vm681_vm13 = vmor %vm679_vm12, %vm680_vm11 }
 0x2ec   :  { %v676_v45 = vsub.f32 1.0, %v675_v44 }
 0x2ee   :  { %v677_v47 = vmul.f32 %v821_v43, %v676_v45 }
 0x2f0   :  { %v678_v49 = vadd.f32 %v821_v43, %v677_v47 }
 0x2f2   :  { %v682_v8 = vsel %vm681_vm13, %v821_v43, %v678_v49 }
 0x2f3   :  { %v687_v53 = vsel %vm684_vm14, %v686_v52, %v682_v8 }
 0x2f4   :  { %v695_v54 = vmul.f32 %v817_v39, %v687_v53  ;;  %v688_v55 = vmul.f32 %v819_v40, %v687_v53 }
 0x2f6   :  { %698 = vperm.xlu2 %776, %v695_v54   ;;  %691 = vperm.xlu1 %775, %v688_v55  }
 0x350   :  { %v699_v18 = vpop.permute.xlu2 %698 }
 0x351   :  { %v701_v57 = vmul.f32 %v699_v18, %v1428_v51 }
 0x368   :  { %v692_v56 = vpop.permute.xlu1 %691 }
 0x369   :  { %v694_v58 = vmul.f32 %v692_v56, %v636_v21 }
 0x36b   :  { %v702_v59 = vadd.f32 %v701_v57, %v694_v58 }
 0x36d   :  { %704 = vrot.lane.b32.xlu2 %v702_v59, %s1038_s4 }
 0x3c7   :  { %v705_v60 = vpop.permute.xlu2 %704 }
 0x3c8   :  { %v707_v62 = vsel %vm152_vm0, %v1435_v61, %v705_v60 }
 0x3c9   :  { %709 = vst.msk [vmem:[#allocation15] sm:$0xff] %vm708_vm15, %v707_v62 }
 0x3ca   :  { %720 = dma.vmem_to_hbm [thread:$0]  %s716_s19, 128, %s718_s1, [#allocation6]  }
 0x3cb   :  { %1022 = dma.done.wait [#allocation6], 128  }
 0x3cc   :  { %1023 = vsyncadd [#allocation6], 4294967168 }
 0x3cd   :  { %1024 = dma.done.wait [#allocation17], 128  }
 0x3ce   :  { %1025 = vsyncadd [#allocation17], 4294967168 }
 0x3cf   :  { %740 = vsyncpa [#allocation5], 1 }
 0x3d0   :  { %741 = vsyncpa [#allocation8], 1 }
 0x3d1   :  { %742 = vsyncpa [#allocation11], 1 }
 0x3d2   :  { %743 = vsyncpa [#allocation14], 1 }
 0x3d3   :  { %744 = vsyncpa [#allocation6], 1 }
 0x3d4   :  { %745 = vsyncpa [#allocation17], 1 }

</bundles_post_ra>
